<compile_context>
chip_gen: v6e
topology: v6e:2x2x1
jax: 0.10.0
libtpu: 0.0.40
codegen_flags: <defaults>
</compile_context>

<pallas_src>
import functools

import jax
import jax.numpy as jnp
from jax import lax
from jax.experimental import pallas as pl
from jax.experimental.pallas import tpu as pltpu

# Make the pure-JAX reference matmuls full f32 so the 1e-4 correctness check is
# meaningful (kernel dots are forced to HIGHEST precision below).
jax.config.update("jax_default_matmul_precision", "highest")


# ----------------------------------------------------------------------------- kernel
def dgm_layer_kernel(x_ref, s_ref, w_ref, whs_ref, b_ref, out_ref):
    dim_x = x_ref.shape[-1]
    dS = s_ref.shape[-1]
    cd = w_ref.dtype                       # MXU operand dtype (f32 or bf16)

    x = x_ref[...]                         # (tb, dim_x)
    s = s_ref[...]                         # (tb, dim_S)
    s_f32 = s.astype(jnp.float32)

    # Single fused pre-activation slab for (Z | G | R | H_x): one K=dim_x+dim_S matmul.
    xs = jnp.concatenate([x.astype(cd), s.astype(cd)], axis=-1)   # VMEM-only concat
    pre = (
        jnp.dot(xs, w_ref[...],
                preferred_element_type=jnp.float32,
                precision=lax.Precision.HIGHEST)
        + b_ref[...]
    )                                      # (tb, 4*dS) f32

    # One contiguous 3*dS-lane tanh for Z|G|R (single EUP stream), then lane slices.
    zgr = jnp.tanh(pre[:, : 3 * dS])
    Z = zgr[:, 0 * dS:1 * dS]
    G = zgr[:, 1 * dS:2 * dS]
    R = zgr[:, 2 * dS:3 * dS]

    # H block of `pre` already holds x @ Wh_x + bh (the S-rows of the H column-block
    # are zero in the fused weight); add only the data-dependent (S*R) @ Wh_s part.
    h_pre = pre[:, 3 * dS:] + jnp.dot(
        (s_f32 * R).astype(cd), whs_ref[...],
        preferred_element_type=jnp.float32,
        precision=lax.Precision.HIGHEST,
    )
    H = jnp.tanh(h_pre)

    out_ref[...] = ((1.0 - G) * H + Z * s_f32).astype(out_ref.dtype)


# ----------------------------------------------------------------------------- packing
def pack_params(params, dim_x, dim_S, dtype=jnp.float32):
    """Pre-pack PyTorch-layout per-gate params (W: (dim_S, dim_x+dim_S), b: (dim_S,))
    into one fused (dim_x+dim_S, 4*dim_S) slab. Call ONCE at init, not per forward."""
    w_cols, b_cols = [], []
    for g in ("Z", "G", "R", "H"):
        W, b = params[g]
        Wt = W.T.astype(dtype)                         # (dim_x+dim_S, dim_S), (in,out)
        if g == "H":
            # H's S-rows act on S*R; handled by the separate Wh_s matmul in-kernel.
            Wt = Wt.at[dim_x:, :].set(0)
        w_cols.append(Wt)
        b_cols.append(b.astype(jnp.float32))
    Wh, _ = params["H"]
    return dict(
        w=jnp.concatenate(w_cols, axis=1),                      # (dim_x+dim_S, 4*dim_S)
        wh_s=Wh.T[dim_x:, :].astype(dtype),                     # (dim_S, dim_S)
        b=jnp.concatenate(b_cols).reshape(1, 4 * dim_S),        # (1, 4*dim_S) f32
    )


def _round_up(n, m):
    return ((n + m - 1) // m) * m


def _tiling_for_device(batch, tile_b):
    """Generation-aware batch tile + scoped-VMEM budget."""
    try:
        kind = jax.devices()[0].device_kind.lower()
    except Exception:  # pragma: no cover - be robust to exotic runtimes
        kind = ""
    is_v7 = "v7" in kind

    if tile_b is None:
        if is_v7:
            # 64 MiB VMEM/TC; keep >=2 grid steps so ("parallel",) uses both TCs.
            tile_b = min(2048, max(8, _round_up((batch + 1) // 2, 8)))
        elif ("v6" in kind) or ("v5" in kind):
            tile_b = 8192          # 128 MiB physical VMEM; big tiles amortize step cost
        else:
            tile_b = 2048          # conservative default under the 32 MiB scoped limit

    tb = max(8, min(_round_up(tile_b, 8), _round_up(batch, 8)))

    # ~9 live f32 slabs, each lane-padded to 128 -> tb * 128 * 4 * 9 bytes.
    est = tb * 128 * 4 * 9
    vmem = None
    if est > (24 << 20):
        vmem = (48 << 20) if is_v7 else min(96 << 20, max(64 << 20, 2 * est))
    return tb, vmem


# ----------------------------------------------------------------------------- wrapper
@functools.partial(jax.jit, static_argnames=("tile_b",))
def dgm_layer_pallas(x, S, packed, *, tile_b=None):
    B, dim_x = x.shape
    _, dim_S = S.shape
    n_in, n_out = dim_x + dim_S, 4 * dim_S
    w, wh_s, b = packed["w"], packed["wh_s"], packed["b"]

    tb, vmem = _tiling_for_device(B, tile_b)
    grid = (pl.cdiv(B, tb),)   # no jnp.pad: the partial last block is masked by Pallas

    cp_kwargs = dict(dimension_semantics=("parallel",))   # v7x: shard batch over 2 TCs
    if vmem is not None:
        cp_kwargs["vmem_limit_bytes"] = int(vmem)

    out = pl.pallas_call(
        dgm_layer_kernel,
        out_shape=jax.ShapeDtypeStruct((B, dim_S), x.dtype),
        grid=grid,
        in_specs=[
            pl.BlockSpec((tb, dim_x), lambda i: (i, 0)),     # x: tiled over batch
            pl.BlockSpec((tb, dim_S), lambda i: (i, 0)),     # S: tiled over batch
            pl.BlockSpec((n_in, n_out), lambda i: (0, 0)),   # fused W: VMEM-resident
            pl.BlockSpec((dim_S, dim_S), lambda i: (0, 0)),  # Wh_s:   VMEM-resident
            pl.BlockSpec((1, n_out), lambda i: (0, 0)),      # bias:   VMEM-resident
        ],
        out_specs=pl.BlockSpec((tb, dim_S), lambda i: (i, 0)),
        compiler_params=pltpu.CompilerParams(**cp_kwargs),
    )(x, S, w, wh_s, b)
    return out


# ----------------------------------------------------------------------------- reference
def dgm_layer_ref(x, S, params):
    """Pure-JAX reference matching the PyTorch forward exactly."""
    def gate(W, b, inp):
        return jnp.tanh(inp @ W.T + b)

    x_S = jnp.concatenate([x, S], axis=1)
    Z = gate(*params["Z"], x_S)
    G = gate(*params["G"], x_S)
    R = gate(*params["R"], x_S)
    H = gate(*params["H"], jnp.concatenate([x, S * R], axis=1))
    return (1.0 - G) * H + Z * S


def init_params(key, dim_x, dim_S):
    """Deterministic init mimicking nn.Linear uniform(-1/sqrt(in), 1/sqrt(in))."""
    nIn = dim_x + dim_S
    bound = 1.0 / jnp.sqrt(jnp.float32(nIn))
    params = {}
    for g in ("Z", "G", "R", "H"):
        key, kw, kb = jax.random.split(key, 3)
        W = jax.random.uniform(kw, (dim_S, nIn), jnp.float32, -bound, bound)
        b = jax.random.uniform(kb, (dim_S,), jnp.float32, -bound, bound)
        params[g] = (W, b)
    return params


if __name__ == "__main__":
    dim_x, dim_S = 16, 32
    key = jax.random.PRNGKey(0)
    key, kp = jax.random.split(key)
    params = init_params(kp, dim_x, dim_S)
    packed = pack_params(params, dim_x, dim_S)        # done once, reused across calls

    # Small shape (single grid step).
    B = 8
    key, kx, ks = jax.random.split(key, 3)
    x = jax.random.normal(kx, (B, dim_x), jnp.float32)
    S = jax.random.normal(ks, (B, dim_S), jnp.float32)
    out = jax.block_until_ready(dgm_layer_pallas(x, S, packed))
    ref = dgm_layer_ref(x, S, params)
    assert out.shape == (B, dim_S)
    assert jnp.allclose(out, ref, atol=1e-4, rtol=1e-4), (
        f"max err {jnp.max(jnp.abs(out - ref))}"
    )

    # Ragged batch: multi-step grid + masked partial last block (no jnp.pad copy).
    B2 = 200
    key, kx2, ks2 = jax.random.split(key, 3)
    x2 = jax.random.normal(kx2, (B2, dim_x), jnp.float32)
    S2 = jax.random.normal(ks2, (B2, dim_S), jnp.float32)
    out2 = jax.block_until_ready(dgm_layer_pallas(x2, S2, packed, tile_b=64))
    ref2 = dgm_layer_ref(x2, S2, params)
    assert out2.shape == (B2, dim_S)
    assert jnp.allclose(out2, ref2, atol=1e-4, rtol=1e-4), (
        f"max err {jnp.max(jnp.abs(out2 - ref2))}"
    )

    # bf16 operand path (halved HBM traffic / bf16 MXU on v6e+); f32 accumulation and
    # f32 tanh/gating, so it deviates only mildly from the f32 reference.
    packed_bf16 = pack_params(params, dim_x, dim_S, dtype=jnp.bfloat16)
    out3 = jax.block_until_ready(
        dgm_layer_pallas(
            x2.astype(jnp.bfloat16), S2.astype(jnp.bfloat16), packed_bf16, tile_b=64
        )
    )
    assert out3.shape == (B2, dim_S)
    assert jnp.allclose(out3.astype(jnp.float32), ref2, atol=1e-1, rtol=1e-1), (
        f"bf16 max err {jnp.max(jnp.abs(out3.astype(jnp.float32) - ref2))}"
    )

    print("KERNEL_OK")
</pallas_src>

<mosaic_0001>
module attributes {stable_mosaic.version = 11 : i64} {
  func.func @dgm_layer_kernel(%arg0: i32, %arg1: memref<8x16xf32, #tpu.memory_space<vmem>>, %arg2: memref<8x32xf32, #tpu.memory_space<vmem>>, %arg3: memref<48x128xf32, #tpu.memory_space<vmem>>, %arg4: memref<32x32xf32, #tpu.memory_space<vmem>>, %arg5: memref<1x128xf32, #tpu.memory_space<vmem>>, %arg6: memref<8x32xf32, #tpu.memory_space<vmem>>) attributes {dimension_semantics = [#tpu.dimension_semantics<parallel>], iteration_bounds = array<i64: 1>, scalar_prefetch = 0 : i64, scratch_operands = 0 : i64, tpu.core_type = #tpu.core_type<tc>, window_params = [{transform_indices = @transform_0, window_bounds = array<i64: 8, 16>}, {transform_indices = @transform_1, window_bounds = array<i64: 8, 32>}, {pipeline_mode = #tpu.pipeline_mode<synchronous>, transform_indices = @transform_2, window_bounds = array<i64: 48, 128>}, {pipeline_mode = #tpu.pipeline_mode<synchronous>, transform_indices = @transform_3, window_bounds = array<i64: 32, 32>}, {pipeline_mode = #tpu.pipeline_mode<synchronous>, transform_indices = @transform_4, window_bounds = array<i64: 1, 128>}, {transform_indices = @transform_5, window_bounds = array<i64: 8, 32>}]} {
    %c0 = arith.constant 0 : index
    %c0_0 = arith.constant 0 : index
    %0 = vector.load %arg1[%c0, %c0_0] : memref<8x16xf32, #tpu.memory_space<vmem>>, vector<8x16xf32>
    %c0_1 = arith.constant 0 : index
    %c0_2 = arith.constant 0 : index
    %1 = vector.load %arg2[%c0_1, %c0_2] : memref<8x32xf32, #tpu.memory_space<vmem>>, vector<8x32xf32>
    %2 = tpu.concatenate %0, %1 in 1 : vector<8x16xf32>, vector<8x32xf32> -> vector<8x48xf32>
    %c0_3 = arith.constant 0 : index
    %c0_4 = arith.constant 0 : index
    %3 = vector.load %arg3[%c0_3, %c0_4] : memref<48x128xf32, #tpu.memory_space<vmem>>, vector<48x128xf32>
    %cst = arith.constant dense<0.000000e+00> : vector<8x128xf32>
    %4 = tpu.matmul %2, %3, %cst {dimension_numbers = #tpu.dot_dimension_numbers<[1], [0], [0], [1], [0, 0, 1, 1], [], []>, precision = #tpu.contract_precision<fp32>} : vector<8x48xf32>, vector<48x128xf32>, vector<8x128xf32> -> vector<8x128xf32>
    %c0_5 = arith.constant 0 : index
    %c0_6 = arith.constant 0 : index
    %5 = vector.load %arg5[%c0_5, %c0_6] : memref<1x128xf32, #tpu.memory_space<vmem>>, vector<1x128xf32>
    %6 = vector.broadcast %5 : vector<1x128xf32> to vector<8x128xf32>
    %7 = arith.addf %4, %6 : vector<8x128xf32>
    %8 = vector.extract_strided_slice %7 {offsets = [0, 0], sizes = [8, 96], strides = [1, 1]} : vector<8x128xf32> to vector<8x96xf32>
    %9 = math.tanh %8 : vector<8x96xf32>
    %10 = vector.extract_strided_slice %9 {offsets = [0, 0], sizes = [8, 32], strides = [1, 1]} : vector<8x96xf32> to vector<8x32xf32>
    %11 = vector.extract_strided_slice %9 {offsets = [0, 32], sizes = [8, 32], strides = [1, 1]} : vector<8x96xf32> to vector<8x32xf32>
    %12 = vector.extract_strided_slice %9 {offsets = [0, 64], sizes = [8, 32], strides = [1, 1]} : vector<8x96xf32> to vector<8x32xf32>
    %13 = vector.extract_strided_slice %7 {offsets = [0, 96], sizes = [8, 32], strides = [1, 1]} : vector<8x128xf32> to vector<8x32xf32>
    %14 = arith.mulf %1, %12 : vector<8x32xf32>
    %c0_7 = arith.constant 0 : index
    %c0_8 = arith.constant 0 : index
    %15 = vector.load %arg4[%c0_7, %c0_8] : memref<32x32xf32, #tpu.memory_space<vmem>>, vector<32x32xf32>
    %cst_9 = arith.constant dense<0.000000e+00> : vector<8x32xf32>
    %16 = tpu.matmul %14, %15, %cst_9 {dimension_numbers = #tpu.dot_dimension_numbers<[1], [0], [0], [1], [0, 0, 1, 1], [], []>, precision = #tpu.contract_precision<fp32>} : vector<8x32xf32>, vector<32x32xf32>, vector<8x32xf32> -> vector<8x32xf32>
    %17 = arith.addf %13, %16 : vector<8x32xf32>
    %18 = math.tanh %17 : vector<8x32xf32>
    %cst_10 = arith.constant 1.000000e+00 : f32
    %19 = vector.broadcast %cst_10 : f32 to vector<8x32xf32>
    %20 = arith.subf %19, %11 : vector<8x32xf32>
    %21 = arith.mulf %20, %18 : vector<8x32xf32>
    %22 = arith.mulf %10, %1 : vector<8x32xf32>
    %23 = arith.addf %21, %22 : vector<8x32xf32>
    %c0_11 = arith.constant 0 : index
    %c0_12 = arith.constant 0 : index
    %24 = vector.load %arg6[%c0_11, %c0_12] : memref<8x32xf32, #tpu.memory_space<vmem>>, vector<8x32xf32>
    tpu.vector_store %arg6[%c0_11, %c0_12], %23 {strides = array<i32>} : memref<8x32xf32, #tpu.memory_space<vmem>>, vector<8x32xf32>,
    return
  }
  func.func @transform_0(%arg0: i32) -> (i32, i32) {
    %c0_i32 = arith.constant 0 : i32
    %c0_i32_0 = arith.constant 0 : i32
    return %arg0, %c0_i32 : i32, i32
  }
  func.func @transform_1(%arg0: i32) -> (i32, i32) {
    %c0_i32 = arith.constant 0 : i32
    %c0_i32_0 = arith.constant 0 : i32
    return %arg0, %c0_i32 : i32, i32
  }
  func.func @transform_2(%arg0: i32) -> (i32, i32) {
    %c0_i32 = arith.constant 0 : i32
    %c0_i32_0 = arith.constant 0 : i32
    %c0_i32_1 = arith.constant 0 : i32
    return %c0_i32, %c0_i32_0 : i32, i32
  }
  func.func @transform_3(%arg0: i32) -> (i32, i32) {
    %c0_i32 = arith.constant 0 : i32
    %c0_i32_0 = arith.constant 0 : i32
    %c0_i32_1 = arith.constant 0 : i32
    return %c0_i32, %c0_i32_0 : i32, i32
  }
  func.func @transform_4(%arg0: i32) -> (i32, i32) {
    %c0_i32 = arith.constant 0 : i32
    %c0_i32_0 = arith.constant 0 : i32
    %c0_i32_1 = arith.constant 0 : i32
    return %c0_i32, %c0_i32_0 : i32, i32
  }
  func.func @transform_5(%arg0: i32) -> (i32, i32) {
    %c0_i32 = arith.constant 0 : i32
    %c0_i32_0 = arith.constant 0 : i32
    return %arg0, %c0_i32 : i32, i32
  }
}

</mosaic_0001>

<bundles_post_ra>
// kernel: dgm_layer_pallas.1
= control target key start
LH: loop header
LB: loop body
LE: loop exit
PB: predicated region body
PF: predicated region fallthrough
CT: control target
= control target key end

     0   :  { %10 = vsyncpa [#allocation3], 0  ;;  %s1798_s0 = inlined_call_operand.hbm [shape: f32[8,16], index: 0, kind: input, shape index: {}]   ;;  %s1799_s1 = inlined_call_operand.hbm [shape: f32[8,32], index: 1, kind: input, shape index: {}]   ;;  %s1800_s2 = inlined_call_operand.hbm [shape: f32[48,128], index: 2, kind: input, shape index: {}]   ;;  %s1801_s3 = inlined_call_operand.hbm [shape: f32[32,32], index: 3, kind: input, shape index: {}]   ;;  %s1802_s4 = inlined_call_operand.vmem [shape: f32[1,128], index: 4, kind: input, shape index: {}]   ;;  %s1803_s5 = inlined_call_operand.hbm [shape: f32[8,32], index: 5, kind: output, shape index: {}]  }
   0x1   :  { %11 = vsyncpa [#allocation6], 0 }
   0x2   :  { %12 = vsyncpa [#allocation9], 0 }
   0x3   :  { %13 = vsyncpa [#allocation4], 0  ;;  %s1501_s18 = smov [#allocation5]   ;;  %s1502_s20 = smov [#allocation2]  }
   0x4   :  { %s30_s19 = sshll.u32 %s1501_s18, 4  ;;  %s20_s21 = sshll.u32 %s1502_s20, 4  ;;  %s31_s19 = int_to_ptr.vmem [resolvable:$true] %s30_s19  ;;  %s21_s21 = int_to_ptr.vmem [resolvable:$true] %s20_s21 }
   0x5   :  { %s1401_s22 = scalar_lea.vmem %s31_s19, 128  ;;  %p1406_p1 = scmp.lt.s32.totalorder %s31_s19, %s31_s19 }
   0x6   :  { %p1402_p0 = scmp.ne.s32.totalorder %s31_s19, %s1401_s22  ;;  %p1407_p2 = scmp.lt.s32.totalorder %s1401_s22, %s1401_s22 }
   0x8   :  { %p1408_p3 = por %p1407_p2, %p1406_p1 }
   0xa   :  { %p1409_p4 = pnand %p1408_p3, %p1402_p0 }
   0xc   :  { %1412 = shalt.err (!%p1409_p4)
}
   0xd   :  { %33 = dma.hbm_to_vmem [thread:$0]  %s1799_s1, 128, %s31_s19, [#allocation6]  }
   0xe   :  { %s1421_s25 = scalar_lea.vmem %s21_s21, 128  ;;  %p1426_p6 = scmp.lt.s32.totalorder %s21_s21, %s21_s21 }
   0xf   :  { %p1422_p5 = scmp.ne.s32.totalorder %s21_s21, %s1421_s25  ;;  %p1427_p7 = scmp.lt.s32.totalorder %s1421_s25, %s1421_s25 }
  0x11   :  { %p1428_p8 = por %p1427_p7, %p1426_p6 }
  0x13   :  { %p1429_p9 = pnand %p1428_p8, %p1422_p5 }
  0x15   :  { %1432 = shalt.err (!%p1429_p9)
}
  0x16   :  { %23 = dma.hbm_to_vmem [thread:$0]  %s1798_s0, 128, %s21_s21, [#allocation3]  }
  0x17   :  { %s1503_s28 = smov [#allocation7]  }
  0x18   :  { %s39_s29 = sshll.u32 %s1503_s28, 4  ;;  %s40_s29 = int_to_ptr.vmem [resolvable:$true] %s39_s29 }
  0x19   :  { %s1441_s30 = scalar_lea.vmem %s40_s29, 768  ;;  %p1446_p11 = scmp.lt.s32.totalorder %s40_s29, %s40_s29 }
  0x1a   :  { %p1442_p10 = scmp.ne.s32.totalorder %s40_s29, %s1441_s30  ;;  %p1447_p12 = scmp.lt.s32.totalorder %s1441_s30, %s1441_s30 }
  0x1c   :  { %p1448_p13 = por %p1447_p12, %p1446_p11 }
  0x1e   :  { %p1449_p0 = pnand %p1448_p13, %p1442_p10 }
  0x20   :  { %1452 = shalt.err (!%p1449_p0)
}
  0x21   :  { %s1504_s1 = smov 128   ;;  %s1505_s6 = smov 8  }
  0x22   :  { %45 = dma.hbm_to_vmem [thread:$0]  %s1800_s2, 768, %s40_s29, [#allocation6], %s1504_s1, %s1504_s1, %s1505_s6  }
  0x23   :  { %s1506_s9 = smov [#allocation8]  }
  0x24   :  { %s51_s10 = sshll.u32 %s1506_s9, 4  ;;  %s52_s10 = int_to_ptr.vmem [resolvable:$true] %s51_s10 }
  0x25   :  { %s1461_s0 = scalar_lea.vmem %s52_s10, 512  ;;  %p1466_p2 = scmp.lt.s32.totalorder %s52_s10, %s52_s10 }
  0x26   :  { %p1462_p1 = scmp.ne.s32.totalorder %s52_s10, %s1461_s0  ;;  %p1467_p3 = scmp.lt.s32.totalorder %s1461_s0, %s1461_s0 }
  0x28   :  { %p1468_p4 = por %p1467_p3, %p1466_p2 }
  0x2a   :  { %p1469_p5 = pnand %p1468_p4, %p1462_p1 }
  0x2c   :  { %1472 = shalt.err (!%p1469_p5)
}
  0x2d   :  { %57 = dma.hbm_to_vmem [thread:$0]  %s1801_s3, 512, %s52_s10, [#allocation9], %s1504_s1, %s1504_s1, %s1505_s6  }
  0x2e   :  { %1493 = dma.done.wait [#allocation3], 128  }
  0x2f   :  { %1494 = vsyncadd [#allocation3], 4294967168 }
  0x30   :  { %1495 = dma.done.wait [#allocation6], 896  }
  0x31   :  { %1496 = vsyncadd [#allocation6], 4294966400 }
  0x32   :  { %1497 = dma.done.wait [#allocation9], 512  }
  0x33   :  { %1498 = vsyncadd [#allocation9], 4294966784  ;;  %v1507_v0 = vmov 0.0   ;;  %vm1508_vm0 = vmmov 0   ;;  %v1562_v1 = vld [vmem:[#allocation5] sm:$0xff]  ;;  %v85_v2 = vld [vmem:[#allocation7 + $0x28] sm:$0xff] }
  0x34   :  { %1235 = vmatprep.subr.mxu1 %v1507_v0  ;;  %1220 = vmatprep.subr.mxu0 %v1507_v0  ;;  %v84_v3 = vld [vmem:[#allocation7 + $0x20] sm:$0xff]  ;;  %s1509_s2 = smov 16   ;;  %v1565_v4 = vand.u32 4294901760, %v85_v2  ;;  %v83_v6 = vld [vmem:[#allocation7 + $0x18] sm:$0xff]  ;;  %v82_v7 = vld [vmem:[#allocation7 + $0x10] sm:$0xff]  ;;  %vm78_vm1 = vcmask 130048  }
  0x35   :  { %1247 = vmatprep.mubr.msk.f32.mxu1 %vm1508_vm0, %v1507_v0  ;;  %1232 = vmatprep.mubr.msk.f32.mxu0 %vm1508_vm0, %v1507_v0  ;;  %v1567_v5 = vand.u32 4294901760, %v84_v3  ;;  %v1569_v8 = vand.u32 4294901760, %v83_v6  ;;  %v1571_v9 = vand.u32 4294901760, %v82_v7  ;;  %v81_v10 = vld [vmem:[#allocation7 + $0x8] sm:$0xff]  ;;  %v80_v11 = vld [vmem:[#allocation7] sm:$0xff]  ;;  %v72_v38 = vld [vmem:[#allocation2] sm:$0xff] }
  0x36   :  { %75 = vrot.lane.b32.xlu0 %v1562_v1, %s1509_s2  ;;  %v1574_v12 = vsub.f32 %v85_v2, %v1565_v4  ;;  %1221 = vmatpush3.msra.mxu0 %v1565_v4  ;;  %v1580_v14 = vand.u32 4294901760, %v81_v10  ;;  %v1582_v15 = vand.u32 4294901760, %v80_v11  ;;  %vm93_vm2 = vcmask 392192   ;;  %v617_v47 = vld [vmem:[#allocation8 + $0x18] sm:$0xff]  ;;  %v616_v48 = vld [vmem:[#allocation8 + $0x10] sm:$0xff]  ;;  %s1511_s14 = smov 32  }
  0x37   :  { %v1577_v13 = vsub.f32 %v84_v3, %v1567_v5  ;;  %v1585_v16 = vsub.f32 %v83_v6, %v1569_v8  ;;  %v1588_v17 = vsub.f32 %v82_v7, %v1571_v9  ;;  %1222 = vmatprep.subr.mxu0 %v1507_v0  ;;  %v1703_v49 = vand.u32 4294901760, %v617_v47  ;;  %v1147_v3 = vld [vmem:[%s1802_s4] ss:$0 sm:$0xff]  ;;  %s1510_s4 = smov 64   ;;  %s1512_s15 = smov 96  }
  0x38   :  { %v201_v18 = vand.u32 4294901760, %v1574_v12  ;;  %v1594_v20 = vsub.f32 %v81_v10, %v1580_v14  ;;  %1223 = vmatpush3.msra.mxu0 %v1567_v5  ;;  %v1598_v21 = vsub.f32 %v80_v11, %v1582_v15  ;;  %v1705_v50 = vand.u32 4294901760, %v616_v48  ;;  %v615_v11 = vld [vmem:[#allocation8 + $0x8] sm:$0xff]  ;;  %s1513_s16 = smov [#allocation10]  }
  0x39   :  { %v208_v19 = vand.u32 4294901760, %v1577_v13  ;;  %v215_v22 = vand.u32 4294901760, %v1585_v16  ;;  %v222_v23 = vand.u32 4294901760, %v1588_v17  ;;  %1224 = vmatprep.subr.mxu0 %v1507_v0  ;;  %v1708_v51 = vsub.f32 %v617_v47, %v1703_v49  ;;  %s1136_s17 = sshll.u32 %s1513_s16, 4  ;;  %s1137_s17 = int_to_ptr.vmem [resolvable:$true] %s1136_s17 }
  0x3a   :  { %v202_v24 = vsub.f32 %v1574_v12, %v201_v18  ;;  %v229_v26 = vand.u32 4294901760, %v1594_v20  ;;  %1225 = vmatpush3.msra.mxu0 %v1569_v8  ;;  %v236_v31 = vand.u32 4294901760, %v1598_v21  ;;  %v1711_v52 = vsub.f32 %v616_v48, %v1705_v50  ;;  %s1473_s18 = scalar_lea.vmem %s1137_s17, 128  ;;  %p1478_p7 = scmp.lt.s32.totalorder %s1137_s17, %s1137_s17 }
  0x3b   :  { %v209_v25 = vsub.f32 %v1577_v13, %v208_v19  ;;  %v216_v27 = vsub.f32 %v1585_v16, %v215_v22  ;;  %1226 = vmatprep.subr.mxu0 %v1507_v0  ;;  %v223_v30 = vsub.f32 %v1588_v17, %v222_v23  ;;  %v728_v53 = vand.u32 4294901760, %v1708_v51  ;;  %p1474_p6 = scmp.ne.s32.totalorder %s1137_s17, %s1473_s18  ;;  %p1479_p8 = scmp.lt.s32.totalorder %s1473_s18, %s1473_s18 }
  0x3c   :  { %v203_v28 = vand.u32 4294901760, %v202_v24  ;;  %1227 = vmatpush3.msra.mxu0 %v1571_v9  ;;  %v230_v33 = vsub.f32 %v1594_v20, %v229_v26  ;;  %v237_v35 = vsub.f32 %v1598_v21, %v236_v31  ;;  %v735_v54 = vand.u32 4294901760, %v1711_v52 }
  0x3d   :  { %v210_v29 = vand.u32 4294901760, %v209_v25  ;;  %1228 = vmatprep.subr.mxu0 %v1507_v0  ;;  %v217_v32 = vand.u32 4294901760, %v216_v27  ;;  %v224_v34 = vand.u32 4294901760, %v223_v30  ;;  %v729_v55 = vsub.f32 %v1708_v51, %v728_v53  ;;  %p1480_p9 = por %p1479_p8, %p1478_p7 }
  0x3e   :  { %1236 = vmatpush3.msra.mxu1 %v203_v28  ;;  %1229 = vmatpush3.msra.mxu0 %v1580_v14  ;;  %v231_v36 = vand.u32 4294901760, %v230_v33  ;;  %v238_v37 = vand.u32 4294901760, %v237_v35  ;;  %v736_v56 = vsub.f32 %v1711_v52, %v735_v54  ;;  %vm618_vm3 = vcmask 261120  }
  0x3f   :  { %1237 = vmatprep.subr.mxu1 %v1507_v0  ;;  %1230 = vmatprep.subr.mxu0 %v1507_v0  ;;  %v730_v57 = vand.u32 4294901760, %v729_v55  ;;  %p1481_p10 = pnand %p1480_p9, %p1474_p6 }
  0x40   :  { %1238 = vmatpush3.msra.mxu1 %v210_v29  ;;  %1231 = vmatpush3.msra.mxu0 %v1582_v15  ;;  %v737_v58 = vand.u32 4294901760, %v736_v56 }
  0x41   :  { %1239 = vmatprep.subr.mxu1 %v1507_v0  ;;  %1250 = vmatprep.subr.mxu0 %v1507_v0 }
  0x42   :  { %1240 = vmatpush3.msra.mxu1 %v217_v32 }
  0x43   :  { %1241 = vmatprep.subr.mxu1 %v1507_v0 }
  0x44   :  { %1242 = vmatpush3.msra.mxu1 %v224_v34 }
  0x45   :  { %1243 = vmatprep.subr.mxu1 %v1507_v0 }
  0x46   :  { %1244 = vmatpush3.msra.mxu1 %v231_v36 }
  0x47   :  { %1245 = vmatprep.subr.mxu1 %v1507_v0 }
  0x48   :  { %1246 = vmatpush3.msra.mxu1 %v238_v37 }
  0x49   :  { %1265 = vmatprep.subr.mxu1 %v1507_v0 }
  0xa8   :  { %v76_v39 = vpop.permute.xlu0 %75 }
  0xa9   :  { %v79_v40 = vsel %vm78_vm1, %v72_v38, %v76_v39 }
  0xaa   :  { %v95_v41 = vsel %vm93_vm2, %v79_v40, 0 }
  0xab   :  { %v168_v42 = vand.u32 4294901760, %v95_v41 }
  0xad   :  { %v169_v43 = vsub.f32 %v95_v41, %v168_v42  ;;  %1248 = vmatmul.mubr.f32.vlgmr.msra.gmra.mxu1 %v168_v42 }
  0xae   :  { %1266 = vmatpush3.msra.mxu1 %v1565_v4  ;;  %1277 = vmatprep.mubr.msk.f32.mxu1 %vm1508_vm0, %v1507_v0 }
  0xaf   :  { %1267 = vmatprep.subr.mxu1 %v1507_v0  ;;  %v170_v44 = vand.u32 4294901760, %v169_v43 }
  0xb0   :  { %1268 = vmatpush3.msra.mxu1 %v1567_v5 }
  0xb1   :  { %1269 = vmatprep.subr.mxu1 %v1507_v0  ;;  %v171_v45 = vsub.f32 %v169_v43, %v170_v44 }
  0xb2   :  { %1270 = vmatpush3.msra.mxu1 %v1569_v8 }
  0xb3   :  { %1271 = vmatprep.subr.mxu1 %v1507_v0  ;;  %v172_v46 = vand.u32 4294901760, %v171_v45 }
  0xb4   :  { %1272 = vmatpush3.msra.mxu1 %v1571_v9 }
  0xb5   :  { %1273 = vmatprep.subr.mxu1 %v1507_v0  ;;  %1233 = vmatmul.mubr.f32.vlgmr.msra.gmra.mxu0 %v172_v46 }
  0xb6   :  { %1251 = vmatpush3.msra.mxu0 %v1574_v12  ;;  %1274 = vmatpush3.msra.mxu1 %v1580_v14  ;;  %v653_v12 = vand.u32 4294901760, %v615_v11 }
  0xb7   :  { %1252 = vmatprep.subr.mxu0 %v1507_v0  ;;  %1275 = vmatprep.subr.mxu1 %v1507_v0 }
  0xb8   :  { %1253 = vmatpush3.msra.mxu0 %v1577_v13  ;;  %1276 = vmatpush3.msra.mxu1 %v1582_v15  ;;  %v614_v13 = vld [vmem:[#allocation8] sm:$0xff] }
  0xb9   :  { %1254 = vmatprep.subr.mxu0 %v1507_v0  ;;  %1278 = vmatmul.mubr.f32.vlgmr.msra.gmra.mxu1 %v170_v44 }
  0xba   :  { %1295 = vmatprep.subr.mxu1 %v1507_v0  ;;  %1255 = vmatpush3.msra.mxu0 %v1585_v16  ;;  %v656_v16 = vand.u32 4294901760, %v614_v13 }
  0xbb   :  { %1296 = vmatpush3.msra.mxu1 %v1565_v4  ;;  %1256 = vmatprep.subr.mxu0 %v1507_v0 }
  0xbc   :  { %1297 = vmatprep.subr.mxu1 %v1507_v0  ;;  %1257 = vmatpush3.msra.mxu0 %v1588_v17 }
  0xbd   :  { %1298 = vmatpush3.msra.mxu1 %v1567_v5  ;;  %1258 = vmatprep.subr.mxu0 %v1507_v0 }
  0xbe   :  { %1299 = vmatprep.subr.mxu1 %v1507_v0  ;;  %1259 = vmatpush3.msra.mxu0 %v1594_v20  ;;  %v1734_v20 = vsub.f32 %v614_v13, %v656_v16 }
  0xbf   :  { %1300 = vmatpush3.msra.mxu1 %v1569_v8  ;;  %1260 = vmatprep.subr.mxu0 %v1507_v0 }
  0xc0   :  { %1301 = vmatprep.subr.mxu1 %v1507_v0  ;;  %1261 = vmatpush3.msra.mxu0 %v1598_v21  ;;  %v749_v24 = vand.u32 4294901760, %v1734_v20 }
  0xc1   :  { %1262 = vmatprep.mubr.msk.f32.mxu0 %vm1508_vm0, %v1507_v0  ;;  %1302 = vmatpush3.msra.mxu1 %v1571_v9 }
  0xc2   :  { %1263 = vmatmul.mubr.f32.vlgmr.msra.gmra.mxu0 %v169_v43  ;;  %1280 = vmatprep.subr.mxu0 %v1507_v0 }
  0xc3   :  { %1303 = vmatprep.subr.mxu1 %v1507_v0  ;;  %1281 = vmatpush3.msra.mxu0 %v201_v18 }
  0xc4   :  { %1304 = vmatpush3.msra.mxu1 %v1580_v14  ;;  %1282 = vmatprep.subr.mxu0 %v1507_v0 }
  0xc5   :  { %1305 = vmatprep.subr.mxu1 %v1507_v0  ;;  %1283 = vmatpush3.msra.mxu0 %v208_v19 }
  0xc6   :  { %1306 = vmatpush3.msra.mxu1 %v1582_v15  ;;  %1307 = vmatprep.mubr.msk.f32.mxu1 %vm1508_vm0, %v1507_v0  ;;  %v1730_v15 = vsub.f32 %v615_v11, %v653_v12 }
  0xc7   :  { %1284 = vmatprep.subr.mxu0 %v1507_v0  ;;  %1308 = vmatmul.mubr.f32.vlgmr.msra.gmra.mxu1 %v168_v42 }
  0xc8   :  { %1285 = vmatpush3.msra.mxu0 %v215_v22  ;;  %1292 = vmatprep.mubr.msk.f32.mxu0 %vm1508_vm0, %v1507_v0  ;;  %v742_v19 = vand.u32 4294901760, %v1730_v15 }
  0xc9   :  { %1286 = vmatprep.subr.mxu0 %v1507_v0  ;;  %1321 = vmatprep.subr.mxu1 %v1507_v0 }
  0xca   :  { %1287 = vmatpush3.msra.mxu0 %v222_v23  ;;  %1329 = vmatprep.mubr.msk.f32.mxu1 %vm1508_vm0, %v1507_v0  ;;  %v743_v23 = vsub.f32 %v1730_v15, %v742_v19 }
  0xcb   :  { %1288 = vmatprep.subr.mxu0 %v1507_v0  ;;  %1322 = vmatpush3.msra.mxu1 %v730_v57 }
  0xcc   :  { %1289 = vmatpush3.msra.mxu0 %v229_v26  ;;  %1323 = vmatprep.subr.mxu1 %v1507_v0  ;;  %v744_v25 = vand.u32 4294901760, %v743_v23  ;;  %v750_v26 = vsub.f32 %v1734_v20, %v749_v24 }
  0xcd   :  { %1290 = vmatprep.subr.mxu0 %v1507_v0  ;;  %1324 = vmatpush3.msra.mxu1 %v737_v58 }
  0xce   :  { %1291 = vmatpush3.msra.mxu0 %v236_v31  ;;  %1325 = vmatprep.subr.mxu1 %v1507_v0  ;;  %v751_v27 = vand.u32 4294901760, %v750_v26 }
  0xcf   :  { %1293 = vmatmul.mubr.f32.vlgmr.msra.gmra.mxu0 %v168_v42  ;;  %1310 = vmatprep.subr.mxu0 %v1507_v0 }
  0xd0   :  { %1318 = vmatprep.mubr.msk.f32.mxu0 %vm1508_vm0, %v1507_v0  ;;  %1311 = vmatpush3.msra.mxu0 %v1703_v49 }
  0xd1   :  { %1312 = vmatprep.subr.mxu0 %v1507_v0  ;;  %1326 = vmatpush3.msra.mxu1 %v744_v25 }
  0xd2   :  { %1313 = vmatpush3.msra.mxu0 %v1705_v50  ;;  %1327 = vmatprep.subr.mxu1 %v1507_v0 }
  0xd3   :  { %1314 = vmatprep.subr.mxu0 %v1507_v0  ;;  %1328 = vmatpush3.msra.mxu1 %v751_v27 }
  0xd4   :  { %1315 = vmatpush3.msra.mxu0 %v653_v12  ;;  %1343 = vmatprep.subr.mxu1 %v1507_v0 }
  0xd5   :  { %1316 = vmatprep.subr.mxu0 %v1507_v0 }
  0xd6   :  { %1317 = vmatpush3.msra.mxu0 %v656_v16 }
  0xd7   :  { %1332 = vmatprep.subr.mxu0 %v1507_v0 }
 0x16d   :  { %v275_v59 = vpop.f32.mrf.mxu1 }
 0x16f   :  { %v1249_v60 = vpop.f32.mrf.mxu1 }
 0x175   :  { %v174_v61 = vpop.f32.mrf.mxu0 }
 0x176   :  { %v175_v5 = vadd.f32 %v1147_v3, %v174_v61 }
 0x177   :  { %v1234_v62 = vpop.f32.mrf.mxu0 }
 0x178   :  { %v276_v8 = vadd.f32 %v275_v59, %v175_v5 }
 0x179   :  { %v438_v63 = vpop.f32.mrf.mxu1 }
 0x17b   :  { %v1279_v2 = vpop.f32.mrf.mxu1 }
 0x182   :  { %v359_v4 = vpop.f32.mrf.mxu0 }
 0x183   :  { %v360_v10 = vadd.f32 %v359_v4, %v276_v8 }
 0x184   :  { %v1264_v6 = vpop.f32.mrf.mxu0 }
 0x185   :  { %v439_v14 = vadd.f32 %v438_v63, %v360_v10 }
 0x187   :  { %v604_v7 = vpop.f32.mrf.mxu1 }
 0x189   :  { %v1309_v9 = vpop.f32.mrf.mxu1 }
 0x18f   :  { %v527_v17 = vpop.f32.mrf.mxu0 }
 0x190   :  { %v528_v18 = vadd.f32 %v527_v17, %v439_v14 }
 0x191   :  { %v1294_v21 = vpop.f32.mrf.mxu0 }
 0x192   :  { %v1737_v22 = vadd.f32 %v604_v7, %v528_v18 }
 0x194   :  { %1389 = vtanh.f32 %v1737_v22 }
 0x1a1   :  { %v1747_v28 = vpop.eup %1389 }
 0x1a2   :  { %610 = vrot.lane.b32.xlu0 %v1747_v28, %s1510_s4  ;;  %v1119_v29 = vmul.f32 %v1747_v28, %v1562_v1  ;;  %v1113_v56 = vsub.f32 1.0, %v1747_v28 }
 0x1a6   :  { %1121 = vrot.lane.b32.xlu0 %v1119_v29, %s1511_s14 }
 0x214   :  { %v611_v30 = vpop.permute.xlu0 %610 }
 0x215   :  { %v613_v31 = vmul.f32 %v611_v30, %v1562_v1 }
 0x217   :  { %v620_v32 = vsel %vm618_vm3, %v613_v31, 0 }
 0x218   :  { %v691_v33 = vand.u32 4294901760, %v620_v32  ;;  %v1122_v59 = vpop.permute.xlu0 %1121 }
 0x21a   :  { %v692_v34 = vsub.f32 %v620_v32, %v691_v33  ;;  %1330 = vmatmul.mubr.f32.vlgmr.msra.gmra.mxu1 %v691_v33 }
 0x21b   :  { %1344 = vmatpush3.msra.mxu1 %v1703_v49  ;;  %1351 = vmatprep.mubr.msk.f32.mxu1 %vm1508_vm0, %v1507_v0 }
 0x21c   :  { %1345 = vmatprep.subr.mxu1 %v1507_v0  ;;  %v693_v35 = vand.u32 4294901760, %v692_v34 }
 0x21d   :  { %1346 = vmatpush3.msra.mxu1 %v1705_v50 }
 0x21e   :  { %1347 = vmatprep.subr.mxu1 %v1507_v0  ;;  %v694_v36 = vsub.f32 %v692_v34, %v693_v35 }
 0x21f   :  { %1348 = vmatpush3.msra.mxu1 %v653_v12 }
 0x220   :  { %1349 = vmatprep.subr.mxu1 %v1507_v0  ;;  %v695_v1 = vand.u32 4294901760, %v694_v36 }
 0x221   :  { %1350 = vmatpush3.msra.mxu1 %v656_v16 }
 0x222   :  { %1352 = vmatmul.mubr.f32.vlgmr.msra.gmra.mxu1 %v693_v35  ;;  %1365 = vmatprep.subr.mxu1 %v1507_v0 }
 0x223   :  { %1319 = vmatmul.mubr.f32.vlgmr.msra.gmra.mxu0 %v695_v1  ;;  %1366 = vmatpush3.msra.mxu1 %v1703_v49 }
 0x224   :  { %1333 = vmatpush3.msra.mxu0 %v1708_v51  ;;  %1367 = vmatprep.subr.mxu1 %v1507_v0 }
 0x225   :  { %1334 = vmatprep.subr.mxu0 %v1507_v0  ;;  %1368 = vmatpush3.msra.mxu1 %v1705_v50 }
 0x226   :  { %1335 = vmatpush3.msra.mxu0 %v1711_v52  ;;  %1369 = vmatprep.subr.mxu1 %v1507_v0 }
 0x227   :  { %1336 = vmatprep.subr.mxu0 %v1507_v0  ;;  %1370 = vmatpush3.msra.mxu1 %v653_v12 }
 0x228   :  { %1337 = vmatpush3.msra.mxu0 %v1730_v15  ;;  %1371 = vmatprep.subr.mxu1 %v1507_v0 }
 0x229   :  { %1338 = vmatprep.subr.mxu0 %v1507_v0  ;;  %1340 = vmatprep.mubr.msk.f32.mxu0 %vm1508_vm0, %v1507_v0 }
 0x22a   :  { %1339 = vmatpush3.msra.mxu0 %v1734_v20  ;;  %1372 = vmatpush3.msra.mxu1 %v656_v16 }
 0x22b   :  { %1373 = vmatprep.mubr.msk.f32.mxu1 %vm1508_vm0, %v1507_v0  ;;  %1341 = vmatmul.mubr.f32.vlgmr.msra.gmra.mxu0 %v692_v34 }
 0x22c   :  { %1354 = vmatprep.subr.mxu0 %v1507_v0  ;;  %1374 = vmatmul.mubr.f32.vlgmr.msra.gmra.mxu1 %v691_v33 }
 0x22d   :  { %1355 = vmatpush3.msra.mxu0 %v728_v53  ;;  %1362 = vmatprep.mubr.msk.f32.mxu0 %vm1508_vm0, %v1507_v0 }
 0x22e   :  { %1356 = vmatprep.subr.mxu0 %v1507_v0 }
 0x22f   :  { %1357 = vmatpush3.msra.mxu0 %v735_v54 }
 0x230   :  { %1358 = vmatprep.subr.mxu0 %v1507_v0 }
 0x231   :  { %1359 = vmatpush3.msra.mxu0 %v742_v19 }
 0x232   :  { %1360 = vmatprep.subr.mxu0 %v1507_v0 }
 0x233   :  { %1361 = vmatpush3.msra.mxu0 %v749_v24 }
 0x234   :  { %1363 = vmatmul.mubr.f32.vlgmr.msra.gmra.mxu0 %v691_v33 }
 0x2da   :  { %v788_v37 = vpop.f32.mrf.mxu1 }
 0x2dc   :  { %v1331_v38 = vpop.f32.mrf.mxu1 }
 0x2e2   :  { %v945_v39 = vpop.f32.mrf.mxu1 }
 0x2e3   :  { %v697_v40 = vpop.f32.mrf.mxu0 }
 0x2e4   :  { %v1353_v41 = vpop.f32.mrf.mxu1  ;;  %v789_v45 = vadd.f32 %v788_v37, %v697_v40 }
 0x2e5   :  { %v1320_v42 = vpop.f32.mrf.mxu0 }
 0x2eb   :  { %v868_v43 = vpop.f32.mrf.mxu0 }
 0x2ec   :  { %v1103_v44 = vpop.f32.mrf.mxu1  ;;  %v869_v48 = vadd.f32 %v868_v43, %v789_v45 }
 0x2ed   :  { %v1342_v46 = vpop.f32.mrf.mxu0 }
 0x2ee   :  { %v1375_v47 = vpop.f32.mrf.mxu1  ;;  %v946_v49 = vadd.f32 %v945_v39, %v869_v48 }
 0x2f4   :  { %v1028_v50 = vpop.f32.mrf.mxu0 }
 0x2f5   :  { %v1029_v51 = vadd.f32 %v1028_v50, %v946_v49 }
 0x2f6   :  { %v1364_v52 = vpop.f32.mrf.mxu0 }
 0x2f7   :  { %v1104_v53 = vadd.f32 %v1103_v44, %v1029_v51 }
 0x2f9   :  { %1108 = vrot.lane.b32.xlu1 %v1104_v53, %s1512_s15 }
 0x36b   :  { %v1109_v0 = vpop.permute.xlu1 %1108 }
 0x36c   :  { %v1111_v54 = vadd.f32 %v1109_v0, %v1737_v22 }
 0x36e   :  { %1391 = vtanh.f32 %v1111_v54 }
 0x37b   :  { %v1392_v55 = vpop.eup %1391 }
 0x37c   :  { %1115 = vrot.lane.b32.xlu1 %v1392_v55, %s1510_s4 }
 0x3ee   :  { %v1116_v57 = vpop.permute.xlu1 %1115 }
 0x3ef   :  { %v1118_v58 = vmul.f32 %v1116_v57, %v1113_v56 }
 0x3f1   :  { %v1124_v60 = vadd.f32 %v1122_v59, %v1118_v58 }
 0x3f3   :  { %1126 = vrot.lane.b32.xlu1 %v1124_v60, %s1512_s15 }
 0x465   :  { %v1127_v61 = vpop.permute.xlu1 %1126 }
 0x466   :  { %1129 = vst.msk [vmem:[#allocation10] sm:$0xff] %vm618_vm3, %v1127_v61 }
 0x467   :  { %1484 = shalt.err (!%p1481_p10)
}
 0x468   :  { %1139 = dma.vmem_to_hbm [thread:$0]  %s1137_s17, 128, %s1803_s5, [#allocation4]  }
 0x469   :  { %1499 = dma.done.wait [#allocation4], 128  }
 0x46a   :  { %1500 = vsyncadd [#allocation4], 4294967168 }
 0x46b   :  { %1143 = vsyncpa [#allocation3], 1 }
 0x46c   :  { %1144 = vsyncpa [#allocation6], 1 }
 0x46d   :  { %1145 = vsyncpa [#allocation9], 1 }
 0x46e   :  { %1146 = vsyncpa [#allocation4], 1 }

</bundles_post_ra>
